<compile_context>
chip_gen: v6e
topology: v6e:2x2x1
jax: 0.10.0
libtpu: 0.0.40
codegen_flags: <defaults>
</compile_context>

<pallas_src>
import math
import functools

import numpy as np
import jax
import jax.numpy as jnp
from jax.experimental import pallas as pl
from jax.experimental.pallas import tpu as pltpu

# ----------------------------------------------------------------- configuration
TEMPORAL_EMBEDDING_LIST = [7, 24, 1]   # [day-of-week, hour-of-day, continuous feature]
D_MODEL = 32
MAX_LEN = 12

# derived (mirrors TemporalEmbedding.embeddings())
NUM_EMBEDDINGS = [v for v in TEMPORAL_EMBEDDING_LIST if v > 1]
INDEX_EMBEDDINGS = [i for i, v in enumerate(TEMPORAL_EMBEDDING_LIST) if v > 1]
INDEX_FEATURE = [i for i, v in enumerate(TEMPORAL_EMBEDDING_LIST) if v == 1]
N_EMB = len(NUM_EMBEDDINGS)
N_FEAT = len(INDEX_FEATURE)
NUM_GATE = N_EMB + (2 if N_FEAT > 0 else 1)
VMAX = max(NUM_EMBEDDINGS)

assert N_FEAT >= 1, "demo config uses the continuous-feature branch"


# ----------------------------------------------------------------- constants / params
def make_positional_encoding(max_len, d_model):
    pe = np.zeros((max_len, d_model), np.float32)
    for pos in range(max_len):
        for i in range(0, d_model, 2):
            pe[pos, i] = math.sin(pos / 10000 ** (i / d_model))
            pe[pos, i + 1] = math.cos(pos / 10000 ** (i / d_model))
    return pe


def init_params(key):
    D = D_MODEL
    keys = jax.random.split(key, 5)

    def xavier(k, shape):
        std = math.sqrt(2.0 / (shape[-2] + shape[-1]))
        return (std * jax.random.normal(k, shape)).astype(jnp.float32)

    # nn.Embedding tables, stacked & zero-padded to a common vocab
    # (padded rows are never selected by valid category ids).
    emb = jax.random.normal(keys[0], (N_EMB, VMAX, D)).astype(jnp.float32)
    # feature_tran = nn.Linear(n_feat, d_model)
    wf = xavier(keys[1], (N_FEAT, D))
    bf = (0.1 * jax.random.normal(keys[2], (D,))).astype(jnp.float32)
    # Gated_Dynamic_Connection(num_gate, d_model, d_model): Weight1 | Weight2
    # pre-concatenated on the output axis -> one [D, 2D] dot per gate in-kernel.
    w1 = xavier(keys[3], (NUM_GATE, D, D))
    w2 = xavier(keys[4], (NUM_GATE, D, D))
    gat_w12 = jnp.concatenate([w1, w2], axis=-1)
    pe = jnp.asarray(make_positional_encoding(MAX_LEN, D))   # register_buffer 'pe'
    return dict(emb=emb, wf=wf, bf=bf, gat_w12=gat_w12, pe=pe)


# ----------------------------------------------------------------- kernel
def temporal_embedding_kernel(idx_in_ref, feat_in_ref, pe_in_ref,
                              idx_tar_ref, feat_tar_ref, pe_tar_ref,
                              emb_ref, wf_ref, bf_ref, w12_ref,
                              out_in_ref, out_tar_ref,
                              *, n_emb, n_feat, num_gate, d_model):
    wf = wf_ref[...]                                   # [F, D]
    bf = bf_ref[...]                                   # [1, D]

    def segment(idx_ref, feat_ref, pe_ref, out_ref):
        m_rows = feat_ref.shape[0]                     # B*T rows
        vmax = emb_ref.shape[1]

        gates = []
        # (a) categorical embeddings: in-VMEM one-hot (iota == id) @ table.
        for i in range(n_emb):
            idx = idx_ref[i]                           # [M, 1] int32
            iota = jax.lax.broadcasted_iota(jnp.int32, (m_rows, vmax), 1)
            onehot = (iota == idx).astype(jnp.float32) # [M, Vmax]
            gates.append(jnp.dot(onehot, emb_ref[i],
                                 preferred_element_type=jnp.float32))
        # (b) continuous-feature Linear(F, D): F is tiny, expand as broadcasts
        #     (avoids a degenerate K=1 matmul).
        feat = feat_ref[...]                           # [M, F]
        fg = bf
        for f in range(n_feat):
            fg = fg + feat[:, f:f + 1] * wf[f:f + 1, :]
        gates.append(fg)                               # [M, D]
        # (c) positional-encoding gate (pre-tiled over the batch).
        gates.append(pe_ref[...])                      # [M, D]

        # Gated_Dynamic_Connection (noGC=False), Weight1|Weight2 fused per gate:
        #   out = sum_h a_h * softmax_h(b_h)   (nonan_softmax over the gate axis)
        ab = [jnp.dot(gates[h], w12_ref[h], preferred_element_type=jnp.float32)
              for h in range(num_gate)]                # each [M, 2D]
        a = [x[:, :d_model] for x in ab]
        b = [x[:, d_model:] for x in ab]
        m = b[0]
        for h in range(1, num_gate):
            m = jnp.maximum(m, b[h])
        e = [jnp.exp(b[h] - m) for h in range(num_gate)]
        num = a[0] * e[0]
        den = e[0]
        for h in range(1, num_gate):
            num = num + a[h] * e[h]
            den = den + e[h]
        out_ref[...] = num * pl.reciprocal(den, approx=True)

    segment(idx_in_ref, feat_in_ref, pe_in_ref, out_in_ref)
    segment(idx_tar_ref, feat_tar_ref, pe_tar_ref, out_tar_ref)


# ----------------------------------------------------------------- wrapper
def _full_spec(shape):
    n = len(shape)
    return pl.BlockSpec(shape, lambda i, _n=n: (0,) * _n)


def temporal_embedding_forward(params, chars_in, chars_tar):
    """chars_in: [n_chars,B,P], chars_tar: [n_chars,B,Q] -> ([B,P,D], [B,Q,D])."""
    d_model = D_MODEL
    _, B, P = chars_in.shape
    _, _, Q = chars_tar.shape
    Mi, Mt = B * P, B * Q

    emb_idx = np.asarray(INDEX_EMBEDDINGS)
    feat_idx = np.asarray(INDEX_FEATURE)

    # categorical ids -> [n_emb, M, 1] int32 (one-hot built inside the kernel)
    idx_in = chars_in[emb_idx].astype(jnp.int32).reshape(N_EMB, Mi, 1)
    idx_tar = chars_tar[emb_idx].astype(jnp.int32).reshape(N_EMB, Mt, 1)
    # continuous features -> [M, F]
    feat_in = chars_in[feat_idx].transpose(1, 2, 0).reshape(Mi, N_FEAT)
    feat_tar = chars_tar[feat_idx].transpose(1, 2, 0).reshape(Mt, N_FEAT)
    # positional-encoding rows tiled over the batch (few KiB, one DMA per call)
    pe = params['pe']
    pe_in = jnp.broadcast_to(pe[:P][None], (B, P, d_model)).reshape(Mi, d_model)
    pe_tar = jnp.broadcast_to(pe[:Q][None], (B, Q, d_model)).reshape(Mt, d_model)

    bf2d = params['bf'].reshape(1, d_model)

    kernel = functools.partial(
        temporal_embedding_kernel,
        n_emb=N_EMB, n_feat=N_FEAT, num_gate=NUM_GATE, d_model=d_model)

    operands = (idx_in, feat_in, pe_in, idx_tar, feat_tar, pe_tar,
                params['emb'], params['wf'], bf2d, params['gat_w12'])

    out_in, out_tar = pl.pallas_call(
        kernel,
        grid=(1,),
        in_specs=[_full_spec(tuple(x.shape)) for x in operands],
        out_specs=(_full_spec((Mi, d_model)), _full_spec((Mt, d_model))),
        out_shape=(jax.ShapeDtypeStruct((Mi, d_model), jnp.float32),
                   jax.ShapeDtypeStruct((Mt, d_model), jnp.float32)),
        compiler_params=pltpu.CompilerParams(dimension_semantics=("arbitrary",)),
    )(*operands)

    return out_in.reshape(B, P, d_model), out_tar.reshape(B, Q, d_model)


# ----------------------------------------------------------------- main
if __name__ == "__main__":
    B, P, Q = 2, 8, 4
    key = jax.random.PRNGKey(0)
    k_par, k_in, k_tar = jax.random.split(key, 3)

    params = init_params(k_par)

    # temporal characteristics tensor [n_chars, B, T]: categorical rows hold integer
    # ids (as floats, cast to int32 like the PyTorch .to(torch.int32)), the continuous
    # row holds a real-valued feature.
    def make_chars(k, T):
        rows = []
        ks = jax.random.split(k, len(TEMPORAL_EMBEDDING_LIST))
        for ki, v in zip(ks, TEMPORAL_EMBEDDING_LIST):
            if v > 1:
                rows.append(jax.random.randint(ki, (1, B, T), 0, v).astype(jnp.float32))
            else:
                rows.append(jax.random.uniform(ki, (1, B, T), jnp.float32))
        return jnp.concatenate(rows, axis=0)

    chars_in = make_chars(k_in, P)
    chars_tar = make_chars(k_tar, Q)

    fwd = jax.jit(temporal_embedding_forward)
    out_in, out_tar = fwd(params, chars_in, chars_tar)
    jax.block_until_ready((out_in, out_tar))

    assert out_in.shape == (B, P, D_MODEL)
    assert out_tar.shape == (B, Q, D_MODEL)
    assert bool(jnp.all(jnp.isfinite(out_in))) and bool(jnp.all(jnp.isfinite(out_tar)))
    print("KERNEL_OK")
</pallas_src>

<mosaic_0001>
module attributes {stable_mosaic.version = 11 : i64} {
  func.func @temporal_embedding_kernel(%arg0: i32, %arg1: memref<2x16x1xi32, #tpu.memory_space<vmem>>, %arg2: memref<16x1xf32, #tpu.memory_space<vmem>>, %arg3: memref<16x32xf32, #tpu.memory_space<vmem>>, %arg4: memref<2x8x1xi32, #tpu.memory_space<vmem>>, %arg5: memref<8x1xf32, #tpu.memory_space<vmem>>, %arg6: memref<8x32xf32, #tpu.memory_space<vmem>>, %arg7: memref<2x24x32xf32, #tpu.memory_space<vmem>>, %arg8: memref<1x32xf32, #tpu.memory_space<vmem>>, %arg9: memref<1x32xf32, #tpu.memory_space<vmem>>, %arg10: memref<4x32x64xf32, #tpu.memory_space<vmem>>, %arg11: memref<16x32xf32, #tpu.memory_space<vmem>>, %arg12: memref<8x32xf32, #tpu.memory_space<vmem>>) attributes {dimension_semantics = [#tpu.dimension_semantics<arbitrary>], iteration_bounds = array<i64: 1>, scalar_prefetch = 0 : i64, scratch_operands = 0 : i64, tpu.core_type = #tpu.core_type<tc>, window_params = [{pipeline_mode = #tpu.pipeline_mode<synchronous>, transform_indices = @transform_0, window_bounds = array<i64: 2, 16, 1>}, {pipeline_mode = #tpu.pipeline_mode<synchronous>, transform_indices = @transform_1, window_bounds = array<i64: 16, 1>}, {pipeline_mode = #tpu.pipeline_mode<synchronous>, transform_indices = @transform_2, window_bounds = array<i64: 16, 32>}, {pipeline_mode = #tpu.pipeline_mode<synchronous>, transform_indices = @transform_3, window_bounds = array<i64: 2, 8, 1>}, {pipeline_mode = #tpu.pipeline_mode<synchronous>, transform_indices = @transform_4, window_bounds = array<i64: 8, 1>}, {pipeline_mode = #tpu.pipeline_mode<synchronous>, transform_indices = @transform_5, window_bounds = array<i64: 8, 32>}, {pipeline_mode = #tpu.pipeline_mode<synchronous>, transform_indices = @transform_6, window_bounds = array<i64: 2, 24, 32>}, {pipeline_mode = #tpu.pipeline_mode<synchronous>, transform_indices = @transform_7, window_bounds = array<i64: 1, 32>}, {pipeline_mode = #tpu.pipeline_mode<synchronous>, transform_indices = @transform_8, window_bounds = array<i64: 1, 32>}, {pipeline_mode = #tpu.pipeline_mode<synchronous>, transform_indices = @transform_9, window_bounds = array<i64: 4, 32, 64>}, {pipeline_mode = #tpu.pipeline_mode<synchronous>, transform_indices = @transform_10, window_bounds = array<i64: 16, 32>}, {pipeline_mode = #tpu.pipeline_mode<synchronous>, transform_indices = @transform_11, window_bounds = array<i64: 8, 32>}]} {
    %c0 = arith.constant 0 : index
    %c0_0 = arith.constant 0 : index
    %0 = vector.load %arg8[%c0, %c0_0] : memref<1x32xf32, #tpu.memory_space<vmem>>, vector<1x32xf32>
    %c0_1 = arith.constant 0 : index
    %c0_2 = arith.constant 0 : index
    %1 = vector.load %arg9[%c0_1, %c0_2] : memref<1x32xf32, #tpu.memory_space<vmem>>, vector<1x32xf32>
    %c0_3 = arith.constant 0 : index
    %c0_4 = arith.constant 0 : index
    %c0_5 = arith.constant 0 : index
    %2 = vector.load %arg1[%c0_3, %c0_4, %c0_5] : memref<2x16x1xi32, #tpu.memory_space<vmem>>, vector<1x16x1xi32>
    %3 = vector.shape_cast %2 : vector<1x16x1xi32> to vector<16x1xi32>
    %4 = tpu.iota {dimensions = array<i32: 1>} : vector<16x24xi32>
    %5 = vector.broadcast %3 : vector<16x1xi32> to vector<16x24xi32>
    %6 = arith.cmpi eq, %4, %5 : vector<16x24xi32>
    %7 = arith.extui %6 : vector<16x24xi1> to vector<16x24xi32>
    %8 = arith.sitofp %7 : vector<16x24xi32> to vector<16x24xf32>
    %c0_6 = arith.constant 0 : index
    %c0_7 = arith.constant 0 : index
    %c0_8 = arith.constant 0 : index
    %9 = vector.load %arg7[%c0_6, %c0_7, %c0_8] : memref<2x24x32xf32, #tpu.memory_space<vmem>>, vector<1x24x32xf32>
    %10 = vector.shape_cast %9 : vector<1x24x32xf32> to vector<24x32xf32>
    %cst = arith.constant dense<0.000000e+00> : vector<16x32xf32>
    %11 = tpu.matmul %8, %10, %cst {dimension_numbers = #tpu.dot_dimension_numbers<[1], [0], [0], [1], [0, 0, 1, 1], [], []>} : vector<16x24xf32>, vector<24x32xf32>, vector<16x32xf32> -> vector<16x32xf32>
    %c1 = arith.constant 1 : index
    %c0_9 = arith.constant 0 : index
    %c0_10 = arith.constant 0 : index
    %12 = vector.load %arg1[%c1, %c0_9, %c0_10] : memref<2x16x1xi32, #tpu.memory_space<vmem>>, vector<1x16x1xi32>
    %13 = vector.shape_cast %12 : vector<1x16x1xi32> to vector<16x1xi32>
    %14 = tpu.iota {dimensions = array<i32: 1>} : vector<16x24xi32>
    %15 = vector.broadcast %13 : vector<16x1xi32> to vector<16x24xi32>
    %16 = arith.cmpi eq, %14, %15 : vector<16x24xi32>
    %17 = arith.extui %16 : vector<16x24xi1> to vector<16x24xi32>
    %18 = arith.sitofp %17 : vector<16x24xi32> to vector<16x24xf32>
    %c1_11 = arith.constant 1 : index
    %c0_12 = arith.constant 0 : index
    %c0_13 = arith.constant 0 : index
    %19 = vector.load %arg7[%c1_11, %c0_12, %c0_13] : memref<2x24x32xf32, #tpu.memory_space<vmem>>, vector<1x24x32xf32>
    %20 = vector.shape_cast %19 : vector<1x24x32xf32> to vector<24x32xf32>
    %cst_14 = arith.constant dense<0.000000e+00> : vector<16x32xf32>
    %21 = tpu.matmul %18, %20, %cst_14 {dimension_numbers = #tpu.dot_dimension_numbers<[1], [0], [0], [1], [0, 0, 1, 1], [], []>} : vector<16x24xf32>, vector<24x32xf32>, vector<16x32xf32> -> vector<16x32xf32>
    %c0_15 = arith.constant 0 : index
    %c0_16 = arith.constant 0 : index
    %22 = vector.load %arg2[%c0_15, %c0_16] : memref<16x1xf32, #tpu.memory_space<vmem>>, vector<16x1xf32>
    %23 = vector.broadcast %22 : vector<16x1xf32> to vector<16x32xf32>
    %24 = vector.broadcast %0 : vector<1x32xf32> to vector<16x32xf32>
    %25 = arith.mulf %23, %24 : vector<16x32xf32>
    %26 = vector.broadcast %1 : vector<1x32xf32> to vector<16x32xf32>
    %27 = arith.addf %26, %25 : vector<16x32xf32>
    %c0_17 = arith.constant 0 : index
    %c0_18 = arith.constant 0 : index
    %28 = vector.load %arg3[%c0_17, %c0_18] : memref<16x32xf32, #tpu.memory_space<vmem>>, vector<16x32xf32>
    %c0_19 = arith.constant 0 : index
    %c0_20 = arith.constant 0 : index
    %c0_21 = arith.constant 0 : index
    %29 = vector.load %arg10[%c0_19, %c0_20, %c0_21] : memref<4x32x64xf32, #tpu.memory_space<vmem>>, vector<1x32x64xf32>
    %30 = vector.shape_cast %29 : vector<1x32x64xf32> to vector<32x64xf32>
    %cst_22 = arith.constant dense<0.000000e+00> : vector<16x64xf32>
    %31 = tpu.matmul %11, %30, %cst_22 {dimension_numbers = #tpu.dot_dimension_numbers<[1], [0], [0], [1], [0, 0, 1, 1], [], []>} : vector<16x32xf32>, vector<32x64xf32>, vector<16x64xf32> -> vector<16x64xf32>
    %c1_23 = arith.constant 1 : index
    %c0_24 = arith.constant 0 : index
    %c0_25 = arith.constant 0 : index
    %32 = vector.load %arg10[%c1_23, %c0_24, %c0_25] : memref<4x32x64xf32, #tpu.memory_space<vmem>>, vector<1x32x64xf32>
    %33 = vector.shape_cast %32 : vector<1x32x64xf32> to vector<32x64xf32>
    %cst_26 = arith.constant dense<0.000000e+00> : vector<16x64xf32>
    %34 = tpu.matmul %21, %33, %cst_26 {dimension_numbers = #tpu.dot_dimension_numbers<[1], [0], [0], [1], [0, 0, 1, 1], [], []>} : vector<16x32xf32>, vector<32x64xf32>, vector<16x64xf32> -> vector<16x64xf32>
    %c2 = arith.constant 2 : index
    %c0_27 = arith.constant 0 : index
    %c0_28 = arith.constant 0 : index
    %35 = vector.load %arg10[%c2, %c0_27, %c0_28] : memref<4x32x64xf32, #tpu.memory_space<vmem>>, vector<1x32x64xf32>
    %36 = vector.shape_cast %35 : vector<1x32x64xf32> to vector<32x64xf32>
    %cst_29 = arith.constant dense<0.000000e+00> : vector<16x64xf32>
    %37 = tpu.matmul %27, %36, %cst_29 {dimension_numbers = #tpu.dot_dimension_numbers<[1], [0], [0], [1], [0, 0, 1, 1], [], []>} : vector<16x32xf32>, vector<32x64xf32>, vector<16x64xf32> -> vector<16x64xf32>
    %c3 = arith.constant 3 : index
    %c0_30 = arith.constant 0 : index
    %c0_31 = arith.constant 0 : index
    %38 = vector.load %arg10[%c3, %c0_30, %c0_31] : memref<4x32x64xf32, #tpu.memory_space<vmem>>, vector<1x32x64xf32>
    %39 = vector.shape_cast %38 : vector<1x32x64xf32> to vector<32x64xf32>
    %cst_32 = arith.constant dense<0.000000e+00> : vector<16x64xf32>
    %40 = tpu.matmul %28, %39, %cst_32 {dimension_numbers = #tpu.dot_dimension_numbers<[1], [0], [0], [1], [0, 0, 1, 1], [], []>} : vector<16x32xf32>, vector<32x64xf32>, vector<16x64xf32> -> vector<16x64xf32>
    %41 = vector.extract_strided_slice %31 {offsets = [0, 0], sizes = [16, 32], strides = [1, 1]} : vector<16x64xf32> to vector<16x32xf32>
    %42 = vector.extract_strided_slice %34 {offsets = [0, 0], sizes = [16, 32], strides = [1, 1]} : vector<16x64xf32> to vector<16x32xf32>
    %43 = vector.extract_strided_slice %37 {offsets = [0, 0], sizes = [16, 32], strides = [1, 1]} : vector<16x64xf32> to vector<16x32xf32>
    %44 = vector.extract_strided_slice %40 {offsets = [0, 0], sizes = [16, 32], strides = [1, 1]} : vector<16x64xf32> to vector<16x32xf32>
    %45 = vector.extract_strided_slice %31 {offsets = [0, 32], sizes = [16, 32], strides = [1, 1]} : vector<16x64xf32> to vector<16x32xf32>
    %46 = vector.extract_strided_slice %34 {offsets = [0, 32], sizes = [16, 32], strides = [1, 1]} : vector<16x64xf32> to vector<16x32xf32>
    %47 = vector.extract_strided_slice %37 {offsets = [0, 32], sizes = [16, 32], strides = [1, 1]} : vector<16x64xf32> to vector<16x32xf32>
    %48 = vector.extract_strided_slice %40 {offsets = [0, 32], sizes = [16, 32], strides = [1, 1]} : vector<16x64xf32> to vector<16x32xf32>
    %49 = arith.maximumf %45, %46 : vector<16x32xf32>
    %50 = arith.maximumf %49, %47 : vector<16x32xf32>
    %51 = arith.maximumf %50, %48 : vector<16x32xf32>
    %52 = arith.subf %45, %51 : vector<16x32xf32>
    %53 = math.exp %52 : vector<16x32xf32>
    %54 = arith.subf %46, %51 : vector<16x32xf32>
    %55 = math.exp %54 : vector<16x32xf32>
    %56 = arith.subf %47, %51 : vector<16x32xf32>
    %57 = math.exp %56 : vector<16x32xf32>
    %58 = arith.subf %48, %51 : vector<16x32xf32>
    %59 = math.exp %58 : vector<16x32xf32>
    %60 = arith.mulf %41, %53 : vector<16x32xf32>
    %61 = arith.mulf %42, %55 : vector<16x32xf32>
    %62 = arith.addf %60, %61 : vector<16x32xf32>
    %63 = arith.addf %53, %55 : vector<16x32xf32>
    %64 = arith.mulf %43, %57 : vector<16x32xf32>
    %65 = arith.addf %62, %64 : vector<16x32xf32>
    %66 = arith.addf %63, %57 : vector<16x32xf32>
    %67 = arith.mulf %44, %59 : vector<16x32xf32>
    %68 = arith.addf %65, %67 : vector<16x32xf32>
    %69 = arith.addf %66, %59 : vector<16x32xf32>
    %70 = tpu.reciprocal %69 {approx = true} : vector<16x32xf32> -> vector<16x32xf32>
    %71 = arith.mulf %68, %70 : vector<16x32xf32>
    %c0_33 = arith.constant 0 : index
    %c0_34 = arith.constant 0 : index
    %72 = vector.load %arg11[%c0_33, %c0_34] : memref<16x32xf32, #tpu.memory_space<vmem>>, vector<16x32xf32>
    tpu.vector_store %arg11[%c0_33, %c0_34], %71 {strides = array<i32>} : memref<16x32xf32, #tpu.memory_space<vmem>>, vector<16x32xf32>,
    %c0_35 = arith.constant 0 : index
    %c0_36 = arith.constant 0 : index
    %c0_37 = arith.constant 0 : index
    %73 = vector.load %arg4[%c0_35, %c0_36, %c0_37] : memref<2x8x1xi32, #tpu.memory_space<vmem>>, vector<1x8x1xi32>
    %74 = vector.shape_cast %73 : vector<1x8x1xi32> to vector<8x1xi32>
    %75 = tpu.iota {dimensions = array<i32: 1>} : vector<8x24xi32>
    %76 = vector.broadcast %74 : vector<8x1xi32> to vector<8x24xi32>
    %77 = arith.cmpi eq, %75, %76 : vector<8x24xi32>
    %78 = arith.extui %77 : vector<8x24xi1> to vector<8x24xi32>
    %79 = arith.sitofp %78 : vector<8x24xi32> to vector<8x24xf32>
    %c0_38 = arith.constant 0 : index
    %c0_39 = arith.constant 0 : index
    %c0_40 = arith.constant 0 : index
    %80 = vector.load %arg7[%c0_38, %c0_39, %c0_40] : memref<2x24x32xf32, #tpu.memory_space<vmem>>, vector<1x24x32xf32>
    %81 = vector.shape_cast %80 : vector<1x24x32xf32> to vector<24x32xf32>
    %cst_41 = arith.constant dense<0.000000e+00> : vector<8x32xf32>
    %82 = tpu.matmul %79, %81, %cst_41 {dimension_numbers = #tpu.dot_dimension_numbers<[1], [0], [0], [1], [0, 0, 1, 1], [], []>} : vector<8x24xf32>, vector<24x32xf32>, vector<8x32xf32> -> vector<8x32xf32>
    %c1_42 = arith.constant 1 : index
    %c0_43 = arith.constant 0 : index
    %c0_44 = arith.constant 0 : index
    %83 = vector.load %arg4[%c1_42, %c0_43, %c0_44] : memref<2x8x1xi32, #tpu.memory_space<vmem>>, vector<1x8x1xi32>
    %84 = vector.shape_cast %83 : vector<1x8x1xi32> to vector<8x1xi32>
    %85 = tpu.iota {dimensions = array<i32: 1>} : vector<8x24xi32>
    %86 = vector.broadcast %84 : vector<8x1xi32> to vector<8x24xi32>
    %87 = arith.cmpi eq, %85, %86 : vector<8x24xi32>
    %88 = arith.extui %87 : vector<8x24xi1> to vector<8x24xi32>
    %89 = arith.sitofp %88 : vector<8x24xi32> to vector<8x24xf32>
    %c1_45 = arith.constant 1 : index
    %c0_46 = arith.constant 0 : index
    %c0_47 = arith.constant 0 : index
    %90 = vector.load %arg7[%c1_45, %c0_46, %c0_47] : memref<2x24x32xf32, #tpu.memory_space<vmem>>, vector<1x24x32xf32>
    %91 = vector.shape_cast %90 : vector<1x24x32xf32> to vector<24x32xf32>
    %cst_48 = arith.constant dense<0.000000e+00> : vector<8x32xf32>
    %92 = tpu.matmul %89, %91, %cst_48 {dimension_numbers = #tpu.dot_dimension_numbers<[1], [0], [0], [1], [0, 0, 1, 1], [], []>} : vector<8x24xf32>, vector<24x32xf32>, vector<8x32xf32> -> vector<8x32xf32>
    %c0_49 = arith.constant 0 : index
    %c0_50 = arith.constant 0 : index
    %93 = vector.load %arg5[%c0_49, %c0_50] : memref<8x1xf32, #tpu.memory_space<vmem>>, vector<8x1xf32>
    %94 = vector.broadcast %93 : vector<8x1xf32> to vector<8x32xf32>
    %95 = vector.broadcast %0 : vector<1x32xf32> to vector<8x32xf32>
    %96 = arith.mulf %94, %95 : vector<8x32xf32>
    %97 = vector.broadcast %1 : vector<1x32xf32> to vector<8x32xf32>
    %98 = arith.addf %97, %96 : vector<8x32xf32>
    %c0_51 = arith.constant 0 : index
    %c0_52 = arith.constant 0 : index
    %99 = vector.load %arg6[%c0_51, %c0_52] : memref<8x32xf32, #tpu.memory_space<vmem>>, vector<8x32xf32>
    %c0_53 = arith.constant 0 : index
    %c0_54 = arith.constant 0 : index
    %c0_55 = arith.constant 0 : index
    %100 = vector.load %arg10[%c0_53, %c0_54, %c0_55] : memref<4x32x64xf32, #tpu.memory_space<vmem>>, vector<1x32x64xf32>
    %101 = vector.shape_cast %100 : vector<1x32x64xf32> to vector<32x64xf32>
    %cst_56 = arith.constant dense<0.000000e+00> : vector<8x64xf32>
    %102 = tpu.matmul %82, %101, %cst_56 {dimension_numbers = #tpu.dot_dimension_numbers<[1], [0], [0], [1], [0, 0, 1, 1], [], []>} : vector<8x32xf32>, vector<32x64xf32>, vector<8x64xf32> -> vector<8x64xf32>
    %c1_57 = arith.constant 1 : index
    %c0_58 = arith.constant 0 : index
    %c0_59 = arith.constant 0 : index
    %103 = vector.load %arg10[%c1_57, %c0_58, %c0_59] : memref<4x32x64xf32, #tpu.memory_space<vmem>>, vector<1x32x64xf32>
    %104 = vector.shape_cast %103 : vector<1x32x64xf32> to vector<32x64xf32>
    %cst_60 = arith.constant dense<0.000000e+00> : vector<8x64xf32>
    %105 = tpu.matmul %92, %104, %cst_60 {dimension_numbers = #tpu.dot_dimension_numbers<[1], [0], [0], [1], [0, 0, 1, 1], [], []>} : vector<8x32xf32>, vector<32x64xf32>, vector<8x64xf32> -> vector<8x64xf32>
    %c2_61 = arith.constant 2 : index
    %c0_62 = arith.constant 0 : index
    %c0_63 = arith.constant 0 : index
    %106 = vector.load %arg10[%c2_61, %c0_62, %c0_63] : memref<4x32x64xf32, #tpu.memory_space<vmem>>, vector<1x32x64xf32>
    %107 = vector.shape_cast %106 : vector<1x32x64xf32> to vector<32x64xf32>
    %cst_64 = arith.constant dense<0.000000e+00> : vector<8x64xf32>
    %108 = tpu.matmul %98, %107, %cst_64 {dimension_numbers = #tpu.dot_dimension_numbers<[1], [0], [0], [1], [0, 0, 1, 1], [], []>} : vector<8x32xf32>, vector<32x64xf32>, vector<8x64xf32> -> vector<8x64xf32>
    %c3_65 = arith.constant 3 : index
    %c0_66 = arith.constant 0 : index
    %c0_67 = arith.constant 0 : index
    %109 = vector.load %arg10[%c3_65, %c0_66, %c0_67] : memref<4x32x64xf32, #tpu.memory_space<vmem>>, vector<1x32x64xf32>
    %110 = vector.shape_cast %109 : vector<1x32x64xf32> to vector<32x64xf32>
    %cst_68 = arith.constant dense<0.000000e+00> : vector<8x64xf32>
    %111 = tpu.matmul %99, %110, %cst_68 {dimension_numbers = #tpu.dot_dimension_numbers<[1], [0], [0], [1], [0, 0, 1, 1], [], []>} : vector<8x32xf32>, vector<32x64xf32>, vector<8x64xf32> -> vector<8x64xf32>
    %112 = vector.extract_strided_slice %102 {offsets = [0, 0], sizes = [8, 32], strides = [1, 1]} : vector<8x64xf32> to vector<8x32xf32>
    %113 = vector.extract_strided_slice %105 {offsets = [0, 0], sizes = [8, 32], strides = [1, 1]} : vector<8x64xf32> to vector<8x32xf32>
    %114 = vector.extract_strided_slice %108 {offsets = [0, 0], sizes = [8, 32], strides = [1, 1]} : vector<8x64xf32> to vector<8x32xf32>
    %115 = vector.extract_strided_slice %111 {offsets = [0, 0], sizes = [8, 32], strides = [1, 1]} : vector<8x64xf32> to vector<8x32xf32>
    %116 = vector.extract_strided_slice %102 {offsets = [0, 32], sizes = [8, 32], strides = [1, 1]} : vector<8x64xf32> to vector<8x32xf32>
    %117 = vector.extract_strided_slice %105 {offsets = [0, 32], sizes = [8, 32], strides = [1, 1]} : vector<8x64xf32> to vector<8x32xf32>
    %118 = vector.extract_strided_slice %108 {offsets = [0, 32], sizes = [8, 32], strides = [1, 1]} : vector<8x64xf32> to vector<8x32xf32>
    %119 = vector.extract_strided_slice %111 {offsets = [0, 32], sizes = [8, 32], strides = [1, 1]} : vector<8x64xf32> to vector<8x32xf32>
    %120 = arith.maximumf %116, %117 : vector<8x32xf32>
    %121 = arith.maximumf %120, %118 : vector<8x32xf32>
    %122 = arith.maximumf %121, %119 : vector<8x32xf32>
    %123 = arith.subf %116, %122 : vector<8x32xf32>
    %124 = math.exp %123 : vector<8x32xf32>
    %125 = arith.subf %117, %122 : vector<8x32xf32>
    %126 = math.exp %125 : vector<8x32xf32>
    %127 = arith.subf %118, %122 : vector<8x32xf32>
    %128 = math.exp %127 : vector<8x32xf32>
    %129 = arith.subf %119, %122 : vector<8x32xf32>
    %130 = math.exp %129 : vector<8x32xf32>
    %131 = arith.mulf %112, %124 : vector<8x32xf32>
    %132 = arith.mulf %113, %126 : vector<8x32xf32>
    %133 = arith.addf %131, %132 : vector<8x32xf32>
    %134 = arith.addf %124, %126 : vector<8x32xf32>
    %135 = arith.mulf %114, %128 : vector<8x32xf32>
    %136 = arith.addf %133, %135 : vector<8x32xf32>
    %137 = arith.addf %134, %128 : vector<8x32xf32>
    %138 = arith.mulf %115, %130 : vector<8x32xf32>
    %139 = arith.addf %136, %138 : vector<8x32xf32>
    %140 = arith.addf %137, %130 : vector<8x32xf32>
    %141 = tpu.reciprocal %140 {approx = true} : vector<8x32xf32> -> vector<8x32xf32>
    %142 = arith.mulf %139, %141 : vector<8x32xf32>
    %c0_69 = arith.constant 0 : index
    %c0_70 = arith.constant 0 : index
    %143 = vector.load %arg12[%c0_69, %c0_70] : memref<8x32xf32, #tpu.memory_space<vmem>>, vector<8x32xf32>
    tpu.vector_store %arg12[%c0_69, %c0_70], %142 {strides = array<i32>} : memref<8x32xf32, #tpu.memory_space<vmem>>, vector<8x32xf32>,
    return
  }
  func.func @transform_0(%arg0: i32) -> (i32, i32, i32) {
    %c0_i32 = arith.constant 0 : i32
    %c0_i32_0 = arith.constant 0 : i32
    %c0_i32_1 = arith.constant 0 : i32
    %c0_i32_2 = arith.constant 0 : i32
    return %c0_i32, %c0_i32_0, %c0_i32_1 : i32, i32, i32
  }
  func.func @transform_1(%arg0: i32) -> (i32, i32) {
    %c0_i32 = arith.constant 0 : i32
    %c0_i32_0 = arith.constant 0 : i32
    %c0_i32_1 = arith.constant 0 : i32
    return %c0_i32, %c0_i32_0 : i32, i32
  }
  func.func @transform_2(%arg0: i32) -> (i32, i32) {
    %c0_i32 = arith.constant 0 : i32
    %c0_i32_0 = arith.constant 0 : i32
    %c0_i32_1 = arith.constant 0 : i32
    return %c0_i32, %c0_i32_0 : i32, i32
  }
  func.func @transform_3(%arg0: i32) -> (i32, i32, i32) {
    %c0_i32 = arith.constant 0 : i32
    %c0_i32_0 = arith.constant 0 : i32
    %c0_i32_1 = arith.constant 0 : i32
    %c0_i32_2 = arith.constant 0 : i32
    return %c0_i32, %c0_i32_0, %c0_i32_1 : i32, i32, i32
  }
  func.func @transform_4(%arg0: i32) -> (i32, i32) {
    %c0_i32 = arith.constant 0 : i32
    %c0_i32_0 = arith.constant 0 : i32
    %c0_i32_1 = arith.constant 0 : i32
    return %c0_i32, %c0_i32_0 : i32, i32
  }
  func.func @transform_5(%arg0: i32) -> (i32, i32) {
    %c0_i32 = arith.constant 0 : i32
    %c0_i32_0 = arith.constant 0 : i32
    %c0_i32_1 = arith.constant 0 : i32
    return %c0_i32, %c0_i32_0 : i32, i32
  }
  func.func @transform_6(%arg0: i32) -> (i32, i32, i32) {
    %c0_i32 = arith.constant 0 : i32
    %c0_i32_0 = arith.constant 0 : i32
    %c0_i32_1 = arith.constant 0 : i32
    %c0_i32_2 = arith.constant 0 : i32
    return %c0_i32, %c0_i32_0, %c0_i32_1 : i32, i32, i32
  }
  func.func @transform_7(%arg0: i32) -> (i32, i32) {
    %c0_i32 = arith.constant 0 : i32
    %c0_i32_0 = arith.constant 0 : i32
    %c0_i32_1 = arith.constant 0 : i32
    return %c0_i32, %c0_i32_0 : i32, i32
  }
  func.func @transform_8(%arg0: i32) -> (i32, i32) {
    %c0_i32 = arith.constant 0 : i32
    %c0_i32_0 = arith.constant 0 : i32
    %c0_i32_1 = arith.constant 0 : i32
    return %c0_i32, %c0_i32_0 : i32, i32
  }
  func.func @transform_9(%arg0: i32) -> (i32, i32, i32) {
    %c0_i32 = arith.constant 0 : i32
    %c0_i32_0 = arith.constant 0 : i32
    %c0_i32_1 = arith.constant 0 : i32
    %c0_i32_2 = arith.constant 0 : i32
    return %c0_i32, %c0_i32_0, %c0_i32_1 : i32, i32, i32
  }
  func.func @transform_10(%arg0: i32) -> (i32, i32) {
    %c0_i32 = arith.constant 0 : i32
    %c0_i32_0 = arith.constant 0 : i32
    %c0_i32_1 = arith.constant 0 : i32
    return %c0_i32, %c0_i32_0 : i32, i32
  }
  func.func @transform_11(%arg0: i32) -> (i32, i32) {
    %c0_i32 = arith.constant 0 : i32
    %c0_i32_0 = arith.constant 0 : i32
    %c0_i32_1 = arith.constant 0 : i32
    return %c0_i32, %c0_i32_0 : i32, i32
  }
}

</mosaic_0001>

<bundles_post_ra>
// kernel: temporal_embedding_forward.1
= control target key start
LH: loop header
LB: loop body
LE: loop exit
PB: predicated region body
PF: predicated region fallthrough
CT: control target
= control target key end

     0   :  { %17 = vsyncpa [#allocation3], 0  ;;  %s2082_s0 = inlined_call_operand.vmem [shape: s32[2,16,1], index: 0, kind: input, shape index: {}]   ;;  %s2083_s1 = inlined_call_operand.vmem [shape: f32[16,1], index: 1, kind: input, shape index: {}]   ;;  %s2084_s2 = inlined_call_operand.vmem [shape: f32[16,32], index: 2, kind: input, shape index: {}]   ;;  %s2085_s3 = inlined_call_operand.vmem [shape: s32[2,8,1], index: 3, kind: input, shape index: {}]   ;;  %s2086_s4 = inlined_call_operand.vmem [shape: f32[8,1], index: 4, kind: input, shape index: {}]   ;;  %s2087_s5 = inlined_call_operand.vmem [shape: f32[8,32], index: 5, kind: input, shape index: {}]   ;;  %s2088_s6 = inlined_call_operand.vmem [shape: f32[2,24,32], index: 6, kind: input, shape index: {}]   ;;  %s2089_s7 = inlined_call_operand.vmem [shape: f32[1,32], index: 7, kind: input, shape index: {}]   ;;  %s2090_s8 = inlined_call_operand.hbm [shape: f32[1,32], index: 8, kind: input, shape index: {}]   ;;  %s2091_s9 = inlined_call_operand.vmem [shape: f32[4,32,64], index: 9, kind: input, shape index: {}]   ;;  %s2092_s10 = inlined_call_operand.hbm [shape: f32[16,32], index: 10, kind: output, shape index: {0}]   ;;  %s2093_s11 = inlined_call_operand.hbm [shape: f32[8,32], index: 11, kind: output, shape index: {1}]  }
   0x1   :  { %18 = vsyncpa [#allocation4], 0 }
   0x2   :  { %19 = vsyncpa [#allocation7], 0  ;;  %s1639_s17 = smov [#allocation2]  }
   0x3   :  { %s42_s18 = sshll.u32 %s1639_s17, 4  ;;  %s43_s18 = int_to_ptr.vmem [resolvable:$true] %s42_s18 }
   0x4   :  { %s1581_s19 = scalar_lea.vmem %s43_s18, 16  ;;  %s1585_s20 = scalar_lea.vmem %s43_s18, 32 }
   0x5   :  { %p1582_p0 = scmp.ne.s32.totalorder %s43_s18, %s1581_s19  ;;  %p1586_p1 = scmp.lt.s32.totalorder %s43_s18, %s43_s18 }
   0x6   :  { %p1587_p2 = scmp.lt.s32.totalorder %s1585_s20, %s1581_s19 }
   0x8   :  { %p1588_p3 = por %p1587_p2, %p1586_p1 }
   0xa   :  { %p1589_p4 = pnand %p1588_p3, %p1582_p0 }
   0xc   :  { %1592 = shalt.err (!%p1589_p4)
}
   0xd   :  { %45 = dma.hbm_to_vmem [thread:$0]  %s2090_s8, 16, %s43_s18, [#allocation3]  }
   0xe   :  { %1633 = dma.done.wait [#allocation3], 16  }
   0xf   :  { %1634 = vsyncadd [#allocation3], 4294967280  ;;  %v1640_v0 = vmov 0   ;;  %v1291_v1 = vld [vmem:[%s2082_s0 + $0x10] sm:$0xff]  ;;  %v53_v2 = vld [vmem:[%s2082_s0] sm:$0xff]  ;;  %v55_v18 = vlaneseq  ;;  %vm72_vm0 = vcmask 195584  }
  0x10   :  { %1542 = vset.pattern.permute.xlu1 %v1640_v0  ;;  %1541 = vset.pattern.permute.xlu0 %v1640_v0  ;;  %v1292_v3 = vld [vmem:[%s2082_s0 + $0x18] sm:$0xff]  ;;  %v54_v4 = vld [vmem:[%s2082_s0 + $0x8] sm:$0xff]  ;;  %v1726_v5 = vld [vmem:[%s2088_s6 + $0x10] sm:$0xff]  ;;  %v1641_v22 = vmov 0.0   ;;  %vm288_vm5 = vcmask 261120   ;;  %vm1642_vm8 = vmmov 0  }
  0x11   :  { %158 = vperm.xlu1 %1542, %v1291_v1   ;;  %58 = vperm.xlu0 %1541, %v53_v2   ;;  %v1731_v6 = vld [vmem:[%s2088_s6 + $0x28] sm:$0xff]  ;;  %v1743_v8 = vld [vmem:[%s2088_s6 + $0x20] sm:$0xff]  ;;  %v1763_v12 = vld [vmem:[%s2088_s6 + $0x18] sm:$0xff]  ;;  %v1792_v19 = vand.u32 127, %v55_v18  ;;  %s1643_s19 = smov 96  }
  0x12   :  { %1408 = vmatprep.subr.mxu0 %v1726_v5  ;;  %1417 = vmatprep.subr.mxu1 %v1731_v6  ;;  %v1738_v7 = vld [vmem:[%s2088_s6 + $0x8] sm:$0xff]  ;;  %v254_v10 = vld [vmem:[%s2083_s1] sm:$0xff]  ;;  %v1783_v16 = vld [vmem:[%s2091_s9 + $0x18] sm:$0xff] }
  0x13   :  { %v255_v9 = vld [vmem:[%s2083_s1 + $0x8] sm:$0xff]  ;;  %1409 = vmatpush3.msra.mxu0 %v1726_v5  ;;  %1418 = vmatpush3.msra.mxu1 %v1731_v6  ;;  %v1758_v11 = vld [vmem:[%s2088_s6] sm:$0xff]  ;;  %v1788_v17 = vld [vmem:[%s2091_s9 + $0x38] sm:$0xff] }
  0x14   :  { %1410 = vmatprep.subr.mxu0 %v1738_v7  ;;  %1419 = vmatprep.subr.mxu1 %v1743_v8  ;;  %v1324_v13 = vld [vmem:[%s2085_s3 + $0x8] sm:$0xff]  ;;  %v724_v14 = vld [vmem:[%s2085_s3] sm:$0xff]  ;;  %v1807_v29 = vld [vmem:[%s2091_s9 + $0x10] sm:$0xff] }
  0x15   :  { %161 = vperm.xlu1 %1542, %v1292_v3   ;;  %61 = vperm.xlu0 %1541, %v54_v4   ;;  %v891_v15 = vld [vmem:[%s2086_s4] sm:$0xff]  ;;  %v1812_v30 = vld [vmem:[%s2091_s9 + $0x30] sm:$0xff]  ;;  %v1821_v32 = vld [vmem:[%s2091_s9 + $0x8] sm:$0xff] }
  0x16   :  { %1420 = vmatpush3.msra.mxu1 %v1743_v8  ;;  %1411 = vmatpush3.msra.mxu0 %v1738_v7  ;;  %v1826_v33 = vld [vmem:[%s2091_s9 + $0x28] sm:$0xff]  ;;  %v1300_v35 = vld [vmem:[%s2089_s7] ss:$0 sm:$0xff]  ;;  %v1860_v42 = vld [vmem:[%s2091_s9 + $0x58] sm:$0xff] }
  0x17   :  { %1412 = vmatprep.subr.mxu0 %v1758_v11  ;;  %1421 = vmatprep.subr.mxu1 %v1763_v12  ;;  %v1301_v38 = vld [vmem:[#allocation2] ss:$0 sm:$0xff]  ;;  %v1865_v43 = vld [vmem:[%s2091_s9 + $0x78] sm:$0xff]  ;;  %v1874_v50 = vld [vmem:[%s2091_s9 + $0x50] sm:$0xff] }
  0x18   :  { %1413 = vmatpush3.msra.mxu0 %v1758_v11  ;;  %1422 = vmatpush3.msra.mxu1 %v1763_v12  ;;  %v1846_v40 = vld [vmem:[%s2091_s9] sm:$0xff]  ;;  %v1881_v52 = vld [vmem:[%s2091_s9 + $0x70] sm:$0xff]  ;;  %v1888_v53 = vld [vmem:[%s2091_s9 + $0x48] sm:$0xff] }
  0x19   :  { %263 = vperm.xlu1 %1542, %v255_v9   ;;  %258 = vperm.xlu0 %1541, %v254_v10   ;;  %v1851_v41 = vld [vmem:[%s2091_s9 + $0x20] sm:$0xff]  ;;  %v1895_v55 = vld [vmem:[%s2091_s9 + $0x68] sm:$0xff] }
  0x1a   :  { %1426 = vmatprep.subr.mxu0 %v1783_v16  ;;  %1437 = vmatprep.subr.mxu1 %v1788_v17  ;;  %v1902_v56 = vld [vmem:[%s2091_s9 + $0x40] sm:$0xff]  ;;  %v283_v60 = vld [vmem:[%s2084_s2 + $0x8] sm:$0xff] }
  0x1b   :  { %v1909_v57 = vld [vmem:[%s2091_s9 + $0x60] sm:$0xff] }
  0x1c   :  { %v282_v59 = vld [vmem:[%s2084_s2] sm:$0xff] }
  0x1d   :  { %810 = vperm.xlu1 %1542, %v1324_v13   ;;  %726 = vperm.xlu0 %1541, %v724_v14  }
  0x21   :  { %894 = vperm.xlu0 %1541, %v891_v15  }
  0x8c   :  { %v159_v20 = vpop.permute.xlu1 %158  ;;  %v59_v21 = vpop.permute.xlu0 %58 }
  0x8d   :  { %vm163_vm1 = vcmp.eq.s32.totalorder %v1792_v19, %v159_v20  ;;  %vm63_vm2 = vcmp.eq.s32.totalorder %v1792_v19, %v59_v21 }
  0x8e   :  { %v1287_v23 = vsel %vm63_vm2, 1.0, %v1641_v22  ;;  %v1293_v24 = vsel %vm163_vm1, 1.0, %v1641_v22 }
  0x8f   :  { %1414 = vmatprep.mubr.msk.f32.mxu0 %vm72_vm0, %v1287_v23  ;;  %1423 = vmatprep.mubr.msk.f32.mxu1 %vm72_vm0, %v1293_v24 }
  0x90   :  { %v162_v25 = vpop.permute.xlu1 %161  ;;  %v62_v26 = vpop.permute.xlu0 %61 }
  0x91   :  { %vm164_vm3 = vcmp.eq.s32.totalorder %v1792_v19, %v162_v25  ;;  %vm64_vm4 = vcmp.eq.s32.totalorder %v1792_v19, %v62_v26 }
  0x92   :  { %v1294_v27 = vsel %vm164_vm3, 1.0, %v1641_v22  ;;  %v1288_v28 = vsel %vm64_vm4, 1.0, %v1641_v22 }
  0x93   :  { %1415 = vmatmul.mubr.msk.f32.vlgmr.msra.gmra.mxu0 %vm72_vm0, %v1288_v28  ;;  %1424 = vmatmul.mubr.msk.f32.vlgmr.msra.gmra.mxu1 %vm72_vm0, %v1294_v27 }
  0x94   :  { %v259_v31 = vpop.permute.xlu0 %258  ;;  %1427 = vmatpush3.msra.mxu0 %v1783_v16  ;;  %1438 = vmatpush3.msra.mxu1 %v1788_v17  ;;  %v264_v49 = vpop.permute.xlu1 %263 }
  0x95   :  { %1428 = vmatprep.subr.mxu0 %v1807_v29  ;;  %1439 = vmatprep.subr.mxu1 %v1812_v30  ;;  %v272_v44 = vmul.f32 %v1300_v35, %v259_v31  ;;  %v273_v54 = vmul.f32 %v1300_v35, %v264_v49 }
  0x96   :  { %1429 = vmatpush3.msra.mxu0 %v1807_v29  ;;  %1440 = vmatpush3.msra.mxu1 %v1812_v30 }
  0x97   :  { %1430 = vmatprep.subr.mxu0 %v1821_v32  ;;  %1441 = vmatprep.subr.mxu1 %v1826_v33  ;;  %v280_v51 = vadd.f32 %v1301_v38, %v272_v44  ;;  %v281_v58 = vadd.f32 %v1301_v38, %v273_v54 }
  0x98   :  { %v1834_v34 = vpop.permute.xlu0 %726  ;;  %1431 = vmatpush3.msra.mxu0 %v1821_v32  ;;  %1442 = vmatpush3.msra.mxu1 %v1826_v33  ;;  %v811_v61 = vpop.permute.xlu1 %810 }
  0x99   :  { %1432 = vmatprep.subr.mxu0 %v1846_v40  ;;  %1443 = vmatprep.subr.mxu1 %v1851_v41  ;;  %vm812_vm6 = vcmp.eq.s32.totalorder %v1792_v19, %v811_v61  ;;  %vm728_vm7 = vcmp.eq.s32.totalorder %v1792_v19, %v1834_v34 }
  0x9a   :  { %1433 = vmatpush3.msra.mxu0 %v1846_v40  ;;  %1444 = vmatpush3.msra.mxu1 %v1851_v41  ;;  %v1325_v62 = vsel %vm812_vm6, 1.0, %v1641_v22  ;;  %v1322_v63 = vsel %vm728_vm7, 1.0, %v1641_v22 }
  0x9b   :  { %1448 = vmatprep.subr.mxu0 %v1860_v42  ;;  %1459 = vmatprep.subr.mxu1 %v1865_v43 }
  0x9c   :  { %v895_v36 = vpop.permute.xlu0 %894 }
  0x9d   :  { %v897_v37 = vmul.f32 %v1300_v35, %v895_v36  ;;  %v899_v35 = vld [vmem:[%s2087_s5] sm:$0xff]  ;;  %s1644_s5 = smov [#allocation5]  }
  0x9e   :  { %s1261_s20 = sshll.u32 %s1644_s5, 4  ;;  %s1262_s20 = int_to_ptr.vmem [resolvable:$true] %s1261_s20 }
  0x9f   :  { %v1841_v39 = vadd.f32 %v1301_v38, %v897_v37  ;;  %s1593_s21 = scalar_lea.vmem %s1262_s20, 256  ;;  %p1598_p6 = scmp.lt.s32.totalorder %s1262_s20, %s1262_s20 }
  0xa0   :  { %p1594_p5 = scmp.ne.s32.totalorder %s1262_s20, %s1593_s21  ;;  %p1599_p7 = scmp.lt.s32.totalorder %s1593_s21, %s1593_s21 }
  0xa2   :  { %p1600_p8 = por %p1599_p7, %p1598_p6 }
  0xa4   :  { %p1601_p9 = pnand %p1600_p8, %p1594_p5 }
 0x153   :  { %v1416_v45 = vpop.f32.mrf.mxu0  ;;  %v1425_v46 = vpop.f32.mrf.mxu1 }
 0x155   :  { %v145_v47 = vpop.f32.mrf.mxu0  ;;  %v245_v48 = vpop.f32.mrf.mxu1 }
 0x156   :  { %1434 = vmatprep.mubr.msk.f32.mxu0 %vm288_vm5, %v145_v47  ;;  %1445 = vmatprep.mubr.msk.f32.mxu1 %vm288_vm5, %v245_v48 }
 0x157   :  { %1435 = vmatmul.mubr.msk.f32.vlgmr.msra.gmra.mxu0 %vm288_vm5, %v1416_v45  ;;  %1446 = vmatmul.mubr.msk.f32.vlgmr.msra.gmra.mxu1 %vm288_vm5, %v1425_v46 }
 0x158   :  { %1449 = vmatpush3.msra.mxu0 %v1860_v42  ;;  %1460 = vmatpush3.msra.mxu1 %v1865_v43 }
 0x159   :  { %1450 = vmatprep.subr.mxu0 %v1874_v50  ;;  %1456 = vmatprep.mubr.msk.f32.mxu0 %vm288_vm5, %v280_v51 }
 0x15a   :  { %1461 = vmatprep.subr.mxu1 %v1881_v52  ;;  %1451 = vmatpush3.msra.mxu0 %v1874_v50 }
 0x15b   :  { %1462 = vmatpush3.msra.mxu1 %v1881_v52  ;;  %1452 = vmatprep.subr.mxu0 %v1888_v53 }
 0x15c   :  { %1463 = vmatprep.subr.mxu1 %v1895_v55  ;;  %1453 = vmatpush3.msra.mxu0 %v1888_v53 }
 0x15d   :  { %1464 = vmatpush3.msra.mxu1 %v1895_v55  ;;  %1454 = vmatprep.subr.mxu0 %v1902_v56 }
 0x15e   :  { %1465 = vmatprep.subr.mxu1 %v1909_v57  ;;  %1455 = vmatpush3.msra.mxu0 %v1902_v56 }
 0x15f   :  { %1466 = vmatpush3.msra.mxu1 %v1909_v57  ;;  %1457 = vmatmul.mubr.msk.f32.vlgmr.msra.gmra.mxu0 %vm288_vm5, %v281_v58 }
 0x160   :  { %1467 = vmatprep.mubr.msk.f32.mxu1 %vm288_vm5, %v282_v59  ;;  %1470 = vmatprep.subr.mxu0 %v1641_v22 }
 0x161   :  { %1479 = vmatprep.subr.mxu1 %v1641_v22  ;;  %1468 = vmatmul.mubr.msk.f32.vlgmr.msra.gmra.mxu1 %vm288_vm5, %v283_v60 }
 0x162   :  { %1471 = vmatpush3.msra.mxu0 %v1726_v5  ;;  %1480 = vmatpush3.msra.mxu1 %v1731_v6 }
 0x163   :  { %1472 = vmatprep.subr.mxu0 %v1641_v22  ;;  %1481 = vmatprep.subr.mxu1 %v1641_v22 }
 0x164   :  { %1473 = vmatpush3.msra.mxu0 %v1738_v7  ;;  %1482 = vmatpush3.msra.mxu1 %v1743_v8 }
 0x165   :  { %1474 = vmatprep.subr.mxu0 %v1641_v22  ;;  %1483 = vmatprep.subr.mxu1 %v1641_v22 }
 0x166   :  { %1475 = vmatpush3.msra.mxu0 %v1758_v11  ;;  %1476 = vmatprep.mubr.msk.f32.mxu0 %vm1642_vm8, %v1641_v22 }
 0x167   :  { %1484 = vmatpush3.msra.mxu1 %v1763_v12  ;;  %1485 = vmatprep.mubr.msk.f32.mxu1 %vm1642_vm8, %v1641_v22 }
 0x168   :  { %1477 = vmatmul.mubr.msk.f32.vlgmr.msra.gmra.mxu0 %vm72_vm0, %v1322_v63  ;;  %1486 = vmatmul.mubr.msk.f32.vlgmr.msra.gmra.mxu1 %vm72_vm0, %v1325_v62 }
 0x169   :  { %1488 = vmatprep.subr.mxu0 %v1641_v22  ;;  %1499 = vmatprep.subr.mxu1 %v1641_v22 }
 0x16a   :  { %1489 = vmatpush3.msra.mxu0 %v1783_v16  ;;  %1500 = vmatpush3.msra.mxu1 %v1788_v17 }
 0x16b   :  { %1490 = vmatprep.subr.mxu0 %v1641_v22  ;;  %1501 = vmatprep.subr.mxu1 %v1641_v22 }
 0x16c   :  { %1491 = vmatpush3.msra.mxu0 %v1807_v29  ;;  %1502 = vmatpush3.msra.mxu1 %v1812_v30 }
 0x16d   :  { %1492 = vmatprep.subr.mxu0 %v1641_v22  ;;  %1503 = vmatprep.subr.mxu1 %v1641_v22 }
 0x16e   :  { %1493 = vmatpush3.msra.mxu0 %v1821_v32  ;;  %1504 = vmatpush3.msra.mxu1 %v1826_v33 }
 0x16f   :  { %1494 = vmatprep.subr.mxu0 %v1641_v22  ;;  %1505 = vmatprep.subr.mxu1 %v1641_v22 }
 0x170   :  { %1495 = vmatpush3.msra.mxu0 %v1846_v40  ;;  %1506 = vmatpush3.msra.mxu1 %v1851_v41 }
 0x171   :  { %1496 = vmatprep.mubr.msk.f32.mxu0 %vm1642_vm8, %v1641_v22  ;;  %1507 = vmatprep.mubr.msk.f32.mxu1 %vm1642_vm8, %v1641_v22 }
 0x172   :  { %1510 = vmatprep.subr.mxu0 %v1641_v22  ;;  %1521 = vmatprep.subr.mxu1 %v1641_v22 }
 0x217   :  { %v1972_v0 = vpop.f32.mrf.mxu0  ;;  %v1974_v1 = vpop.f32.mrf.mxu1 }
 0x218   :  { %v629_v4 = vmax.f32 %v1972_v0, %v1974_v1 }
 0x219   :  { %v1976_v2 = vpop.f32.mrf.mxu0  ;;  %v1978_v3 = vpop.f32.mrf.mxu1 }
 0x21a   :  { %v628_v6 = vmax.f32 %v1976_v2, %v1978_v3 }
 0x21f   :  { %v1982_v5 = vpop.f32.mrf.mxu0 }
 0x220   :  { %v631_v7 = vmax.f32 %v629_v4, %v1982_v5 }
 0x221   :  { %v1987_v8 = vpop.f32.mrf.mxu1  ;;  %v1989_v9 = vpop.f32.mrf.mxu0 }
 0x222   :  { %v633_v10 = vmax.f32 %v631_v7, %v1987_v8  ;;  %v630_v11 = vmax.f32 %v628_v6, %v1989_v9 }
 0x223   :  { %v1993_v12 = vpop.f32.mrf.mxu1 }
 0x224   :  { %v635_v13 = vsub.f32 %v1972_v0, %v633_v10  ;;  %v641_v14 = vsub.f32 %v1974_v1, %v633_v10  ;;  %v647_v15 = vsub.f32 %v1982_v5, %v633_v10  ;;  %v653_v16 = vsub.f32 %v1987_v8, %v633_v10 }
 0x225   :  { %v632_v17 = vmax.f32 %v630_v11, %v1993_v12 }
 0x226   :  { %v638_v18 = vmul.f32 1.442695, %v635_v13  ;;  %v644_v19 = vmul.f32 1.442695, %v641_v14  ;;  %v650_v20 = vmul.f32 1.442695, %v647_v15 }
 0x227   :  { %v656_v21 = vmul.f32 1.442695, %v653_v16  ;;  %v634_v23 = vsub.f32 %v1976_v2, %v632_v17  ;;  %v640_v24 = vsub.f32 %v1978_v3, %v632_v17  ;;  %v646_v25 = vsub.f32 %v1989_v9, %v632_v17 }
 0x228   :  { %1543 = vpow2.f32 %v638_v18  ;;  %v803_v26 = vpop.f32.mrf.mxu0  ;;  %v887_v27 = vpop.f32.mrf.mxu1  ;;  %v652_v30 = vsub.f32 %v1993_v12, %v632_v17 }
 0x229   :  { %1545 = vpow2.f32 %v644_v19  ;;  %v636_v28 = vmul.f32 1.442695, %v634_v23  ;;  %v642_v29 = vmul.f32 1.442695, %v640_v24  ;;  %1497 = vmatmul.mubr.msk.f32.vlgmr.msra.gmra.mxu0 %vm288_vm5, %v803_v26  ;;  %1508 = vmatmul.mubr.msk.f32.vlgmr.msra.gmra.mxu1 %vm288_vm5, %v887_v27  ;;  %v648_v33 = vmul.f32 1.442695, %v646_v25 }
 0x22a   :  { %1547 = vpow2.f32 %v650_v20  ;;  %1511 = vmatpush3.msra.mxu0 %v1860_v42  ;;  %1522 = vmatpush3.msra.mxu1 %v1865_v43  ;;  %v1478_v31 = vpop.f32.mrf.mxu0  ;;  %v1487_v32 = vpop.f32.mrf.mxu1  ;;  %v654_v34 = vmul.f32 1.442695, %v652_v30 }
 0x22b   :  { %1549 = vpow2.f32 %v656_v21  ;;  %1512 = vmatprep.subr.mxu0 %v1641_v22  ;;  %1523 = vmatprep.subr.mxu1 %v1641_v22 }
 0x22c   :  { %1551 = vpow2.f32 %v636_v28  ;;  %1513 = vmatpush3.msra.mxu0 %v1874_v50  ;;  %1524 = vmatpush3.msra.mxu1 %v1881_v52 }
 0x22d   :  { %1553 = vpow2.f32 %v642_v29  ;;  %1514 = vmatprep.subr.mxu0 %v1641_v22  ;;  %1525 = vmatprep.subr.mxu1 %v1641_v22 }
 0x22e   :  { %1515 = vmatpush3.msra.mxu0 %v1888_v53  ;;  %1526 = vmatpush3.msra.mxu1 %v1895_v55  ;;  %1555 = vpow2.f32 %v648_v33 }
 0x22f   :  { %1516 = vmatprep.subr.mxu0 %v1641_v22  ;;  %1527 = vmatprep.subr.mxu1 %v1641_v22  ;;  %1557 = vpow2.f32 %v654_v34 }
 0x230   :  { %1517 = vmatpush3.msra.mxu0 %v1902_v56  ;;  %1518 = vmatprep.mubr.msk.f32.mxu0 %vm1642_vm8, %v1641_v22 }
 0x231   :  { %1528 = vmatpush3.msra.mxu1 %v1909_v57  ;;  %1529 = vmatprep.mubr.msk.f32.mxu1 %vm1642_vm8, %v1641_v22 }
 0x232   :  { %1519 = vmatmul.mubr.msk.f32.vlgmr.msra.gmra.mxu0 %vm288_vm5, %v1841_v39  ;;  %1530 = vmatmul.mubr.msk.f32.vlgmr.msra.gmra.mxu1 %vm288_vm5, %v899_v35 }
 0x235   :  { %v1544_v36 = vpop.eup %1543 }
 0x236   :  { %v1546_v37 = vpop.eup %1545  ;;  %662 = vrot.lane.b32.xlu0 %v1544_v36, %s1643_s19 }
 0x237   :  { %v1548_v38 = vpop.eup %1547  ;;  %v681_v40 = vadd.f32 %v1546_v37, %v1544_v36 }
 0x238   :  { %v1550_v41 = vpop.eup %1549 }
 0x239   :  { %v1552_v42 = vpop.eup %1551  ;;  %v695_v43 = vadd.f32 %v1548_v38, %v681_v40  ;;  %700 = vrot.lane.b32.xlu1 %v1550_v41, %s1643_s19 }
 0x23a   :  { %v1554_v44 = vpop.eup %1553  ;;  %672 = vrot.lane.b32.xlu0 %v1546_v37, %s1643_s19 }
 0x23b   :  { %v709_v22 = vadd.f32 %v1550_v41, %v695_v43  ;;  %v680_v45 = vadd.f32 %v1554_v44, %v1552_v42  ;;  %v1556_v39 = vpop.eup %1555 }
 0x23c   :  { %v1558_v47 = vpop.eup %1557 }
 0x23d   :  { %v694_v46 = vadd.f32 %v1556_v39, %v680_v45  ;;  %660 = vrot.lane.b32.xlu1 %v1552_v42, %s1643_s19 }
 0x23e   :  { %686 = vrot.lane.b32.xlu0 %v1548_v38, %s1643_s19 }
 0x23f   :  { %v708_v48 = vadd.f32 %v1558_v47, %v694_v46 }
 0x241   :  { %670 = vrot.lane.b32.xlu1 %v1554_v44, %s1643_s19 }
 0x242   :  { %698 = vrot.lane.b32.xlu0 %v1558_v47, %s1643_s19 }
 0x245   :  { %684 = vrot.lane.b32.xlu1 %v1556_v39, %s1643_s19 }
 0x2a8   :  { %v663_v24 = vpop.permute.xlu0 %662 }
 0x2a9   :  { %v667_v35 = vmul.f32 %v1972_v0, %v663_v24 }
 0x2ab   :  { %v701_v23 = vpop.permute.xlu1 %700 }
 0x2ac   :  { %v673_v26 = vpop.permute.xlu0 %672 }
 0x2ad   :  { %v677_v32 = vmul.f32 %v1974_v1, %v673_v26  ;;  %v705_v1 = vmul.f32 %v1987_v8, %v701_v23 }
 0x2af   :  { %v661_v25 = vpop.permute.xlu1 %660  ;;  %v679_v41 = vadd.f32 %v677_v32, %v667_v35 }
 0x2b0   :  { %v687_v28 = vpop.permute.xlu0 %686  ;;  %v666_v33 = vmul.f32 %v661_v25, %v1976_v2 }
 0x2b1   :  { %v691_v36 = vmul.f32 %v1982_v5, %v687_v28 }
 0x2b3   :  { %v671_v27 = vpop.permute.xlu1 %670  ;;  %v693_v43 = vadd.f32 %v691_v36, %v679_v41 }
 0x2b4   :  { %v676_v30 = vmul.f32 %v671_v27, %v1978_v3  ;;  %v699_v31 = vpop.permute.xlu0 %698 }
 0x2b5   :  { %v704_v3 = vmul.f32 %v699_v31, %v1993_v12  ;;  %v707_v2 = vadd.f32 %v705_v1, %v693_v43 }
 0x2b6   :  { %v678_v38 = vadd.f32 %v676_v30, %v666_v33 }
 0x2b7   :  { %v685_v29 = vpop.permute.xlu1 %684 }
 0x2b8   :  { %v690_v34 = vmul.f32 %v685_v29, %v1989_v9 }
 0x2ba   :  { %v692_v42 = vadd.f32 %v690_v34, %v678_v38 }
 0x2bc   :  { %v706_v45 = vadd.f32 %v704_v3, %v692_v42 }
 0x2e9   :  { %v2038_v49 = vpop.f32.mrf.mxu0  ;;  %v2040_v50 = vpop.f32.mrf.mxu1 }
 0x2ea   :  { %v1208_v53 = vmax.f32 %v2038_v49, %v2040_v50 }
 0x2eb   :  { %v1498_v51 = vpop.f32.mrf.mxu0  ;;  %v1509_v52 = vpop.f32.mrf.mxu1 }
 0x2f2   :  { %v2044_v54 = vpop.f32.mrf.mxu0  ;;  %v2046_v55 = vpop.f32.mrf.mxu1 }
 0x2f3   :  { %v1209_v56 = vmax.f32 %v1208_v53, %v2044_v54 }
 0x2f4   :  { %v1520_v57 = vpop.f32.mrf.mxu0  ;;  %v1531_v58 = vpop.f32.mrf.mxu1 }
 0x2f5   :  { %v1210_v59 = vmax.f32 %v1209_v56, %v2046_v55 }
 0x2f7   :  { %v1211_v60 = vsub.f32 %v2038_v49, %v1210_v59  ;;  %v1214_v61 = vsub.f32 %v2040_v50, %v1210_v59  ;;  %v1217_v62 = vsub.f32 %v2044_v54, %v1210_v59  ;;  %v1220_v63 = vsub.f32 %v2046_v55, %v1210_v59 }
 0x2f9   :  { %v1212_v4 = vmul.f32 1.442695, %v1211_v60  ;;  %v1215_v6 = vmul.f32 1.442695, %v1214_v61  ;;  %v1218_v7 = vmul.f32 1.442695, %v1217_v62 }
 0x2fa   :  { %v1221_v10 = vmul.f32 1.442695, %v1220_v63 }
 0x2fb   :  { %1559 = vpow2.f32 %v1212_v4 }
 0x2fc   :  { %1561 = vpow2.f32 %v1215_v6 }
 0x2fd   :  { %1563 = vpow2.f32 %v1218_v7 }
 0x2fe   :  { %1565 = vpow2.f32 %v1221_v10 }
 0x2ff   :  { %1567 = vrcp.f32 %v708_v48 }
 0x300   :  { %1569 = vrcp.f32 %v709_v22 }
 0x308   :  { %v1560_v11 = vpop.eup %1559 }
 0x309   :  { %v1562_v13 = vpop.eup %1561  ;;  %1224 = vrot.lane.b32.xlu1 %v1560_v11, %s1643_s19 }
 0x30a   :  { %v1234_v14 = vadd.f32 %v1562_v13, %v1560_v11  ;;  %1229 = vrot.lane.b32.xlu0 %v1562_v13, %s1643_s19  ;;  %v1564_v15 = vpop.eup %1563 }
 0x30b   :  { %v1566_v17 = vpop.eup %1565 }
 0x30c   :  { %v1241_v16 = vadd.f32 %v1564_v15, %v1234_v14  ;;  %v1568_v19 = vpop.eup %1567 }
 0x30d   :  { %1236 = vrot.lane.b32.xlu1 %v1564_v15, %s1643_s19  ;;  %v1570_v20 = vpop.eup %1569 }
 0x30e   :  { %v1248_v18 = vadd.f32 %v1566_v17, %v1241_v16  ;;  %1243 = vrot.lane.b32.xlu0 %v1566_v17, %s1643_s19 }
 0x310   :  { %1571 = vrcp.f32 %v1248_v18 }
 0x311   :  { %714 = vrot.lane.b32.xlu1 %v1568_v19, %s1643_s19 }
 0x312   :  { %716 = vrot.lane.b32.xlu0 %v1570_v20, %s1643_s19 }
 0x31d   :  { %v1572_v21 = vpop.eup %1571 }
 0x31e   :  { %1251 = vrot.lane.b32.xlu1 %v1572_v21, %s1643_s19 }
 0x37b   :  { %v1225_v37 = vpop.permute.xlu1 %1224 }
 0x37c   :  { %v1230_v40 = vpop.permute.xlu0 %1229  ;;  %v1227_v46 = vmul.f32 %v1225_v37, %v2038_v49 }
 0x37d   :  { %v1232_v5 = vmul.f32 %v1230_v40, %v2040_v50 }
 0x37f   :  { %v1237_v44 = vpop.permute.xlu1 %1236 }
 0x380   :  { %v1244_v22 = vpop.permute.xlu0 %1243  ;;  %v1239_v12 = vmul.f32 %v1237_v44, %v2044_v54 }
 0x383   :  { %v715_v9 = vpop.permute.xlu1 %714 }
 0x384   :  { %v717_v0 = vpop.permute.xlu0 %716  ;;  %v720_v39 = vmul.f32 %v715_v9, %v706_v45 }
 0x385   :  { %v721_v47 = vmul.f32 %v717_v0, %v707_v2 }
 0x386   :  { %722 = vst.msk [vmem:[#allocation5] sm:$0xff] %vm288_vm5, %v720_v39 }
 0x387   :  { %723 = vst.msk [vmem:[#allocation5 + $0x8] sm:$0xff] %vm288_vm5, %v721_v47 }
 0x388   :  { %1604 = shalt.err (!%p1601_p9)
}
 0x389   :  { %s1645_s22 = smov 128   ;;  %s1646_s23 = smov 8   ;;  %v1233_v8 = vadd.f32 %v1232_v5, %v1227_v46  ;;  %v1246_v49 = vmul.f32 %v1244_v22, %v2046_v55 }
 0x38a   :  { %1267 = dma.vmem_to_hbm [thread:$0]  %s1262_s20, 256, %s2092_s10, [#allocation4], %s1645_s22, %s1645_s22, %s1646_s23  }
 0x38b   :  { %v1240_v48 = vadd.f32 %v1239_v12, %v1233_v8  ;;  %s1647_s25 = smov [#allocation6]  }
 0x38c   :  { %s1274_s1 = sshll.u32 %s1647_s25, 4  ;;  %s1275_s1 = int_to_ptr.vmem [resolvable:$true] %s1274_s1 }
 0x38d   :  { %v1247_v50 = vadd.f32 %v1246_v49, %v1240_v48  ;;  %s1613_s26 = scalar_lea.vmem %s1275_s1, 128  ;;  %p1618_p11 = scmp.lt.s32.totalorder %s1275_s1, %s1275_s1 }
 0x38e   :  { %p1614_p10 = scmp.ne.s32.totalorder %s1275_s1, %s1613_s26  ;;  %p1619_p12 = scmp.lt.s32.totalorder %s1613_s26, %s1613_s26 }
 0x390   :  { %v1252_v51 = vpop.permute.xlu1 %1251  ;;  %p1620_p13 = por %p1619_p12, %p1618_p11 }
 0x391   :  { %v1254_v52 = vmul.f32 %v1252_v51, %v1247_v50 }
 0x392   :  { %p1621_p0 = pnand %p1620_p13, %p1614_p10 }
 0x393   :  { %1255 = vst.msk [vmem:[#allocation6] sm:$0xff] %vm288_vm5, %v1254_v52 }
 0x394   :  { %1624 = shalt.err (!%p1621_p0)
}
 0x395   :  { %1277 = dma.vmem_to_hbm [thread:$0]  %s1275_s1, 128, %s2093_s11, [#allocation7]  }
 0x396   :  { %1635 = dma.done.wait [#allocation4], 256  }
 0x397   :  { %1636 = vsyncadd [#allocation4], 4294967040 }
 0x398   :  { %1637 = dma.done.wait [#allocation7], 128  }
 0x399   :  { %1638 = vsyncadd [#allocation7], 4294967168 }
 0x39a   :  { %1284 = vsyncpa [#allocation3], 1 }
 0x39b   :  { %1285 = vsyncpa [#allocation4], 1 }
 0x39c   :  { %1286 = vsyncpa [#allocation7], 1 }

</bundles_post_ra>
